<compile_context>
chip_gen: v7x
topology: tpu7x:2x2x1
jax: 0.10.0
libtpu: 0.0.40
codegen_flags: <defaults>
</compile_context>

<pallas_src>
import functools

import jax
import jax.numpy as jnp
from jax.experimental import pallas as pl
from jax.experimental.pallas import tpu as pltpu

LANE = 128


def _round_up(x, m):
    return (x + m - 1) // m * m


def _conv_vmem_limit():
    """Generation-aware scoped-VMEM cap for the conv kernels (v5e/v6e: 128 MiB
    physical -> allow big per-batch blocks; v7x/unknown: stay conservative)."""
    try:
        kind = jax.devices()[0].device_kind.lower()
    except Exception:  # pragma: no cover
        kind = ""
    if "v5" in kind or "v6" in kind:
        return 100 * 1024 * 1024
    return 48 * 1024 * 1024


# ----------------------------------------------------------------------------
# Kernel 1: bilinear align_corners=True resize as a lane-dense matmul against
# kron(Rh, Rw); the output-row axis is tiled via the grid so only a slab of the
# kron matrix is ever resident.  bf16 MXU operands, f32 accumulate.
# ----------------------------------------------------------------------------
def _resize_kernel(x_ref, k_ref, o_ref):
    o_ref[...] = jnp.dot(k_ref[...], x_ref[...],
                         preferred_element_type=jnp.float32).astype(o_ref.dtype)


def _interp_matrix(out_size, in_size):
    i = jnp.arange(out_size, dtype=jnp.float32)
    if out_size > 1:
        s = i * (in_size - 1) / (out_size - 1)
    else:
        s = jnp.zeros_like(i)
    i0 = jnp.clip(jnp.floor(s), 0, in_size - 1).astype(jnp.int32)
    i1 = jnp.minimum(i0 + 1, in_size - 1)
    frac = s - i0.astype(jnp.float32)
    rows = jnp.arange(out_size)
    R = jnp.zeros((out_size, in_size), jnp.float32)
    R = R.at[rows, i0].add(1.0 - frac)
    R = R.at[rows, i1].add(frac)
    return R


def bilinear_resize_nhwc(x_nhwc, out_h, out_w):
    n, h, w, c = x_nhwc.shape
    kron = jnp.kron(_interp_matrix(out_h, h), _interp_matrix(out_w, w))
    ohow = out_h * out_w
    t_rows = min(1024, _round_up(ohow, 8))
    mp = _round_up(ohow, t_rows)
    if mp != ohow:
        kron = jnp.pad(kron, ((0, mp - ohow), (0, 0)))
    kron = kron.astype(jnp.bfloat16)                 # bf16 MXU operand
    x_flat = x_nhwc.reshape(n, h * w, c).astype(jnp.bfloat16)
    out = pl.pallas_call(
        _resize_kernel,
        out_shape=jax.ShapeDtypeStruct((n, mp, c), jnp.bfloat16),
        grid=(n, mp // t_rows),
        in_specs=[
            pl.BlockSpec((None, h * w, c), lambda i, j: (i, 0, 0)),
            pl.BlockSpec((t_rows, h * w), lambda i, j: (j, 0)),
        ],
        out_specs=pl.BlockSpec((None, t_rows, c), lambda i, j: (i, j, 0)),
        compiler_params=pltpu.CompilerParams(
            dimension_semantics=("parallel", "parallel")),
    )(x_flat, kron)
    return out[:, :ohow, :].reshape(n, out_h, out_w, c)


# ----------------------------------------------------------------------------
# Halo'd flat layout shared by the conv kernels:
#   feature map (H, W, C) stored as (Hs*Wp, C) with Hs = H+4, Wp = round_up(W+1,8),
#   body at rows [2, 2+H) x cols [0, W), zeros elsewhere.  Every 3x3 dy slab is
#   an aligned row slice; the w = -1 / W halo comes from the zero columns of the
#   neighbouring flat row, so no per-tap window relayout is needed.
# ----------------------------------------------------------------------------


# Kernel 2: conv1(1x1)+BN1+ReLU (low branch, fused) + 3x3 conv over the fused
# channel-concat [x_res | low] + BN2 + ReLU.  Output stored in the halo'd
# layout consumed directly by the head conv.
def _cat_conv_kernel(xa_ref, lowraw_ref, mask_ref, w1_ref, b1_ref,
                     w2a_ref, w2b_ref, scale2_ref, shift2_ref,
                     y2_ref, xascr, rawscr, lowscr, acc,
                     *, H, W, Wp, Hs):
    ca = xascr.shape[-1]
    clow = lowscr.shape[-1]
    cout = acc.shape[-1]
    M = H * Wp               # rows of the conv output body
    Ms = (H + 2) * Wp        # rows of one dy slab

    # Refresh the halo zeros of the x-branch scratch (scratch contents are
    # undefined on entry and not shared across parallel cores).
    xascr[0:2, :, :] = jnp.zeros((2, Wp, ca), xascr.dtype)
    xascr[2 + H:Hs, :, :] = jnp.zeros((Hs - 2 - H, Wp, ca), xascr.dtype)
    xascr[:, W:Wp, :] = jnp.zeros((Hs, Wp - W, ca), xascr.dtype)

    # Aligned (prefix) body copies -- no wrapper-side jnp.pad, no sublane shift.
    xascr[2:2 + H, 0:W, :] = xa_ref[...].astype(xascr.dtype)
    rawscr[2:2 + H, 0:W, :] = lowraw_ref[...].astype(rawscr.dtype)

    # Fused conv1 + BN1 + ReLU on the low-level branch, evaluated directly in
    # the halo'd layout; the mask restores exact zeros outside the body
    # (rawscr's halo region is never initialized, so mask with where()).
    raw2d = rawscr[...].reshape(Hs * Wp, rawscr.shape[-1])
    lowf = jnp.dot(raw2d, w1_ref[...], preferred_element_type=jnp.float32)
    lowf = lowf + b1_ref[...]
    lowf = jnp.where(mask_ref[...] > 0.5, jnp.maximum(lowf, 0.0), 0.0)
    lowscr[...] = lowf.astype(lowscr.dtype).reshape(Hs, Wp, clow)

    # 3x3 conv, taps grouped by dx: aligned slab matmuls, 3 shifted accumulates.
    a_slabs = [xascr[dy:dy + H + 2, :, :].reshape(Ms, ca) for dy in range(3)]
    b_slabs = [lowscr[dy:dy + H + 2, :, :].reshape(Ms, clow) for dy in range(3)]
    for dx in range(3):
        p = None
        for dy in range(3):
            t = dy * 3 + dx
            d = (jnp.dot(a_slabs[dy], w2a_ref[t], preferred_element_type=jnp.float32)
                 + jnp.dot(b_slabs[dy], w2b_ref[t], preferred_element_type=jnp.float32))
            p = d if p is None else p + d
        off = Wp - 1 + dx
        contrib = p[off:off + M, :]
        if dx == 0:
            acc[...] = contrib          # first group: skip the zero-init pass
        else:
            acc[...] += contrib

    # Epilogue: BN2 + ReLU, re-zero the junk columns, store lane-dense straight
    # into the halo'd layout the head conv consumes (no dense repack).
    y = jnp.maximum(acc[...] * scale2_ref[...] + shift2_ref[...], 0.0)
    y = jnp.where(mask_ref[pl.ds(2 * Wp, M), :] > 0.5, y, 0.0)
    y2_ref[pl.ds(2 * Wp, M), :] = y.astype(y2_ref.dtype)
    halo = jnp.zeros((2 * Wp, cout), y2_ref.dtype)
    y2_ref[pl.ds(0, 2 * Wp), :] = halo
    y2_ref[pl.ds((2 + H) * Wp, 2 * Wp), :] = halo


def conv3x3_cat(x_res, low_raw, mask, w1, b1, w2a, w2b, bn2_scale, bn2_shift,
                *, H, W, Wp, Hs):
    n, _, _, ca = x_res.shape
    craw = low_raw.shape[-1]
    clow = w1.shape[-1]
    cout = w2a.shape[-1]
    # TODO(synk): on v7x (64 MiB VMEM) large H/W need row-strip tiling with a
    # 1-row halo instead of one full spatial block per batch element.
    return pl.pallas_call(
        functools.partial(_cat_conv_kernel, H=H, W=W, Wp=Wp, Hs=Hs),
        out_shape=jax.ShapeDtypeStruct((n, Hs * Wp, cout), jnp.bfloat16),
        grid=(n,),
        in_specs=[
            pl.BlockSpec((None, H, W, ca), lambda i: (i, 0, 0, 0)),
            pl.BlockSpec((None, H, W, craw), lambda i: (i, 0, 0, 0)),
            # constant (revisited) blocks; TODO(synk): pl.Buffered(1) here.
            pl.BlockSpec((Hs * Wp, 1), lambda i: (0, 0)),
            pl.BlockSpec((craw, clow), lambda i: (0, 0)),
            pl.BlockSpec((1, clow), lambda i: (0, 0)),
            pl.BlockSpec((9, ca, cout), lambda i: (0, 0, 0)),
            pl.BlockSpec((9, clow, cout), lambda i: (0, 0, 0)),
            pl.BlockSpec((1, cout), lambda i: (0, 0)),
            pl.BlockSpec((1, cout), lambda i: (0, 0)),
        ],
        out_specs=pl.BlockSpec((None, Hs * Wp, cout), lambda i: (i, 0, 0)),
        scratch_shapes=[
            pltpu.VMEM((Hs, Wp, ca), jnp.bfloat16),
            pltpu.VMEM((Hs, Wp, craw), jnp.bfloat16),
            pltpu.VMEM((Hs, Wp, clow), jnp.bfloat16),
            pltpu.VMEM((H * Wp, cout), jnp.float32),
        ],
        compiler_params=pltpu.CompilerParams(
            dimension_semantics=("parallel",),
            vmem_limit_bytes=_conv_vmem_limit()),
    )(x_res, low_raw, mask, w1,
      b1.reshape(1, clow).astype(jnp.float32),
      w2a, w2b,
      bn2_scale.reshape(1, cout).astype(jnp.float32),
      bn2_shift.reshape(1, cout).astype(jnp.float32))


# Kernel 3: 3x3 conv + BN3 + ReLU over the halo'd input (zero copies), with the
# final 1x1 conv (+bias) fused into the epilogue.  Output is bf16, 128-lane
# padded, lane-dense store.
def _head_conv_kernel(y2_ref, w3_ref, scale3_ref, shift3_ref, w4_ref, b4_ref,
                      out_ref, acc, *, H, W, Wp):
    M = H * Wp
    Ls = M + 16   # aligned slab length covering all dx offsets

    slabs = [y2_ref[pl.ds((dy + 1) * Wp - 8, Ls), :] for dy in range(3)]
    for dx in range(3):
        p = None
        for dy in range(3):
            d = jnp.dot(slabs[dy], w3_ref[dy * 3 + dx],
                        preferred_element_type=jnp.float32)
            p = d if p is None else p + d
        contrib = p[dx + 7:dx + 7 + M, :]
        if dx == 0:
            acc[...] = contrib
        else:
            acc[...] += contrib

    z = jnp.maximum(acc[...] * scale3_ref[...] + shift3_ref[...], 0.0)
    logits = jnp.dot(z.astype(w4_ref.dtype), w4_ref[...],
                     preferred_element_type=jnp.float32) + b4_ref[...]
    out_ref[...] = logits.astype(out_ref.dtype)


def conv3x3_head(y2, w3, bn3_scale, bn3_shift, w4, b4, *, H, W, Wp, Hs):
    n = y2.shape[0]
    cin = w3.shape[-1]
    ncp = w4.shape[-1]
    return pl.pallas_call(
        functools.partial(_head_conv_kernel, H=H, W=W, Wp=Wp),
        out_shape=jax.ShapeDtypeStruct((n, H * Wp, ncp), jnp.bfloat16),
        grid=(n,),
        in_specs=[
            pl.BlockSpec((None, Hs * Wp, cin), lambda i: (i, 0, 0)),
            pl.BlockSpec((9, cin, cin), lambda i: (0, 0, 0)),
            pl.BlockSpec((1, cin), lambda i: (0, 0)),
            pl.BlockSpec((1, cin), lambda i: (0, 0)),
            pl.BlockSpec((cin, ncp), lambda i: (0, 0)),
            pl.BlockSpec((1, ncp), lambda i: (0, 0)),
        ],
        out_specs=pl.BlockSpec((None, H * Wp, ncp), lambda i: (i, 0, 0)),
        scratch_shapes=[pltpu.VMEM((H * Wp, cin), jnp.float32)],
        compiler_params=pltpu.CompilerParams(
            dimension_semantics=("parallel",),
            vmem_limit_bytes=_conv_vmem_limit()),
    )(y2, w3,
      bn3_scale.reshape(1, cin).astype(jnp.float32),
      bn3_shift.reshape(1, cin).astype(jnp.float32),
      w4, b4.reshape(1, ncp).astype(jnp.float32))


# ----------------------------------------------------------------------------
# Decoder parameters (deterministic synthetic init; backbone='resnet')
# ----------------------------------------------------------------------------
def init_decoder_params(key, num_classes, low_level_inplanes=256):
    ks = jax.random.split(key, 5)

    def kaiming(k, shape, fan_in):
        return jax.random.normal(k, shape, jnp.float32) * jnp.sqrt(2.0 / fan_in)

    eps = 1e-5
    bn_scale = lambda c: jnp.full((c,), 1.0 / jnp.sqrt(1.0 + eps), jnp.float32)
    bn_shift = lambda c: jnp.zeros((c,), jnp.float32)

    p = {}
    p["w1"] = kaiming(ks[0], (low_level_inplanes, 48), low_level_inplanes)
    p["bn1_scale"], p["bn1_shift"] = bn_scale(48), bn_shift(48)
    p["w2"] = kaiming(ks[1], (3, 3, 304, 256), 304 * 9)      # K = [x(256) | low(48)]
    p["bn2_scale"], p["bn2_shift"] = bn_scale(256), bn_shift(256)
    p["w3"] = kaiming(ks[2], (3, 3, 256, 256), 256 * 9)
    p["bn3_scale"], p["bn3_shift"] = bn_scale(256), bn_shift(256)
    p["w4"] = kaiming(ks[3], (256, num_classes), 256)
    bound = 1.0 / jnp.sqrt(256.0)
    p["b4"] = jax.random.uniform(ks[4], (num_classes,), jnp.float32, -bound, bound)
    return p


def prepare_decoder_params(p, num_classes):
    """Pack raw f32 params into kernel-ready bf16, lane-padded, tap-major layout."""
    c1 = p["w1"].shape[1]                 # 48
    c1p = _round_up(c1, LANE)             # 48 -> 128 (lane-dense low branch)
    ncp = _round_up(num_classes, LANE)    # 8  -> 128 (lane-dense final store)

    prep = {"num_classes": num_classes}

    # conv1 (1x1) with BN1 scale folded into the weight; channels padded to 128.
    w1 = jnp.zeros((p["w1"].shape[0], c1p), jnp.float32).at[:, :c1].set(
        p["w1"] * p["bn1_scale"][None, :])
    prep["w1"] = w1.astype(jnp.bfloat16)
    prep["b1"] = jnp.zeros((c1p,), jnp.float32).at[:c1].set(p["bn1_shift"])

    w2 = p["w2"]
    ca = w2.shape[2] - c1                 # 256 channels from the resized x
    prep["w2a"] = w2[:, :, :ca, :].reshape(9, ca, 256).astype(jnp.bfloat16)
    w2b = jnp.zeros((3, 3, c1p, 256), jnp.float32).at[:, :, :c1, :].set(w2[:, :, ca:, :])
    prep["w2b"] = w2b.reshape(9, c1p, 256).astype(jnp.bfloat16)
    prep["bn2_scale"], prep["bn2_shift"] = p["bn2_scale"], p["bn2_shift"]

    prep["w3"] = p["w3"].reshape(9, 256, 256).astype(jnp.bfloat16)
    prep["bn3_scale"], prep["bn3_shift"] = p["bn3_scale"], p["bn3_shift"]

    w4 = jnp.zeros((256, ncp), jnp.float32).at[:, :num_classes].set(p["w4"])
    prep["w4"] = w4.astype(jnp.bfloat16)
    prep["b4"] = jnp.zeros((ncp,), jnp.float32).at[:num_classes].set(p["b4"])
    return prep


# ----------------------------------------------------------------------------
# Decoder.forward
# ----------------------------------------------------------------------------
def decoder_forward(prep, x_nchw, low_level_feat_nchw):
    n = x_nchw.shape[0]
    _, _, H, W = low_level_feat_nchw.shape
    nc = prep["num_classes"]
    ncp = prep["w4"].shape[-1]
    Wp = _round_up(W + 1, 8)
    Hs = H + 4

    # Body-indicator mask for the halo'd (Hs, Wp) layout.
    idx = jnp.arange(Hs * Wp, dtype=jnp.int32)
    row, col = idx // Wp, idx % Wp
    mask = ((row >= 2) & (row < 2 + H) & (col < W)).astype(jnp.float32)
    mask = mask.reshape(Hs * Wp, 1)

    low_nhwc = jnp.transpose(low_level_feat_nchw, (0, 2, 3, 1)).astype(jnp.bfloat16)
    x_nhwc = jnp.transpose(x_nchw, (0, 2, 3, 1)).astype(jnp.bfloat16)

    # x = F.interpolate(x, (H, W), mode='bilinear', align_corners=True)
    x_res = bilinear_resize_nhwc(x_nhwc, H, W)                        # (n,H,W,256) bf16

    # low = relu(bn1(conv1(low)));  concat([x, low]); last_conv[0..2]
    # (conv1 fused into the kernel; concat never materialized)
    y2 = conv3x3_cat(x_res, low_nhwc, mask,
                     prep["w1"], prep["b1"], prep["w2a"], prep["w2b"],
                     prep["bn2_scale"], prep["bn2_shift"],
                     H=H, W=W, Wp=Wp, Hs=Hs)                          # halo'd layout

    # last_conv[4..8]: 3x3 conv + BN + ReLU, fused with the final 1x1 conv + bias
    # TODO(synk): Dropout(0.5)/Dropout(0.1) omitted (eval-mode identity).
    logits = conv3x3_head(y2, prep["w3"], prep["bn3_scale"], prep["bn3_shift"],
                          prep["w4"], prep["b4"],
                          H=H, W=W, Wp=Wp, Hs=Hs)                     # (n, H*Wp, ncp)

    out = logits.reshape(n, H, Wp, ncp)[:, :, :W, :nc]
    return jnp.transpose(out, (0, 3, 1, 2)).astype(jnp.float32)       # NCHW f32


if __name__ == "__main__":
    num_classes = 8
    key = jax.random.PRNGKey(0)
    kp, kx, kl = jax.random.split(key, 3)

    params = init_decoder_params(kp, num_classes)
    prep = prepare_decoder_params(params, num_classes)

    # ASPP output x: 256 channels at stride 16; low-level feature: 256 ch at stride 4.
    x = jax.random.normal(kx, (2, 256, 4, 4), jnp.float32)
    low_level_feat = jax.random.normal(kl, (2, 256, 16, 16), jnp.float32)

    out = decoder_forward(prep, x, low_level_feat)
    out = jax.block_until_ready(out)

    assert out.shape == (2, num_classes, 16, 16), out.shape
    assert bool(jnp.all(jnp.isfinite(out)))
    print("KERNEL_OK")
</pallas_src>

<mosaic_0001>
module attributes {stable_mosaic.version = 11 : i64} {
  func.func @_resize_kernel(%arg0: i32, %arg1: i32, %arg2: memref<1x16x256xbf16, #tpu.memory_space<vmem>>, %arg3: memref<256x16xbf16, #tpu.memory_space<vmem>>, %arg4: memref<1x256x256xbf16, #tpu.memory_space<vmem>>) attributes {dimension_semantics = [#tpu.dimension_semantics<parallel>, #tpu.dimension_semantics<parallel>], iteration_bounds = array<i64: 2, 1>, scalar_prefetch = 0 : i64, scratch_operands = 0 : i64, tpu.core_type = #tpu.core_type<tc>, window_params = [{transform_indices = @transform_0, window_bounds = array<i64: 1, 16, 256>}, {transform_indices = @transform_1, window_bounds = array<i64: 256, 16>}, {transform_indices = @transform_2, window_bounds = array<i64: 1, 256, 256>}]} {
    %c0 = arith.constant 0 : index
    %c0_0 = arith.constant 0 : index
    %0 = vector.load %arg3[%c0, %c0_0] : memref<256x16xbf16, #tpu.memory_space<vmem>>, vector<256x16xbf16>
    %c0_1 = arith.constant 0 : index
    %c0_2 = arith.constant 0 : index
    %c0_3 = arith.constant 0 : index
    %1 = vector.load %arg2[%c0_1, %c0_2, %c0_3] : memref<1x16x256xbf16, #tpu.memory_space<vmem>>, vector<1x16x256xbf16>
    %2 = vector.shape_cast %1 : vector<1x16x256xbf16> to vector<16x256xbf16>
    %cst = arith.constant dense<0.000000e+00> : vector<256x256xf32>
    %3 = tpu.matmul %0, %2, %cst {dimension_numbers = #tpu.dot_dimension_numbers<[1], [0], [0], [1], [0, 0, 1, 1], [], []>} : vector<256x16xbf16>, vector<16x256xbf16>, vector<256x256xf32> -> vector<256x256xf32>
    %4 = arith.truncf %3 : vector<256x256xf32> to vector<256x256xbf16>
    %c0_4 = arith.constant 0 : index
    %c0_5 = arith.constant 0 : index
    %c0_6 = arith.constant 0 : index
    %5 = vector.load %arg4[%c0_4, %c0_5, %c0_6] : memref<1x256x256xbf16, #tpu.memory_space<vmem>>, vector<1x256x256xbf16>
    %6 = vector.shape_cast %5 : vector<1x256x256xbf16> to vector<256x256xbf16>
    %7 = vector.shape_cast %4 : vector<256x256xbf16> to vector<1x256x256xbf16>
    tpu.vector_store %arg4[%c0_4, %c0_5, %c0_6], %7 {strides = array<i32>} : memref<1x256x256xbf16, #tpu.memory_space<vmem>>, vector<1x256x256xbf16>,
    return
  }
  func.func @transform_0(%arg0: i32, %arg1: i32) -> (i32, i32, i32) {
    %c0_i32 = arith.constant 0 : i32
    %c0_i32_0 = arith.constant 0 : i32
    %c0_i32_1 = arith.constant 0 : i32
    return %arg0, %c0_i32, %c0_i32_0 : i32, i32, i32
  }
  func.func @transform_1(%arg0: i32, %arg1: i32) -> (i32, i32) {
    %c0_i32 = arith.constant 0 : i32
    %c0_i32_0 = arith.constant 0 : i32
    return %arg1, %c0_i32 : i32, i32
  }
  func.func @transform_2(%arg0: i32, %arg1: i32) -> (i32, i32, i32) {
    %c0_i32 = arith.constant 0 : i32
    %c0_i32_0 = arith.constant 0 : i32
    return %arg0, %arg1, %c0_i32 : i32, i32, i32
  }
}

</mosaic_0001>

<bundles_post_ra>
// kernel: tpu_custom_call.1
= control target key start
LH: loop header
LB: loop body
LE: loop exit
PB: predicated region body
PF: predicated region fallthrough
CT: control target
= control target key end

     0   :  { %7 = vsyncpa [#allocation3], 0  ;;  %s1385_s0 = inlined_call_operand.vmem [shape: bf16[2,16,256], index: 0, kind: input, shape index: {}]   ;;  %s1386_s1 = inlined_call_operand.vmem [shape: bf16[256,16], index: 1, kind: input, shape index: {}]   ;;  %s1387_s2 = inlined_call_operand.hbm [shape: bf16[2,256,256], index: 2, kind: output, shape index: {}]  }
   0x1   :  { %9 = vsyncpa [#allocation3 + $0x1], 0  ;;  %s1167_s9 = smov 0   ;;  %s1169_s10 = smov 0  }
   0x2   :  { %s1171_s11 = smov 0   ;;  %s1173_s12 = smov 0  }
   0x3   :  { %s1175_s13 = smov 0   ;;  %s1177_s14 = smov 0  }
   0x4 LB: > { %s875_s15 = sadd.s32 4294967295, %s1146_s14   ;;  %s876_s16 = sadd.s32 4294967294, %s1146_s14   ;;  %s1146_s14 = sphi %s1177_s14, %s15_s14   ;;  %s1142_s13 = sphi %s1175_s13, %s1394_s13   ;;  %s1138_s12 = sphi %s1173_s12, %s1393_s12   ;;  %s1134_s11 = sphi %s1171_s11, %s1392_s11   ;;  %s1130_s10 = sphi %s1169_s10, %s1391_s10   ;;  %s1126_s9 = sphi %s1167_s9, %s1390_s9  }
   0x5   : > { %s27_s17 = sadd.s32 1, %s1142_s13  ;;  %s88_s18 = sadd.s32 1, %s1134_s11 }
   0x6   : > { %p29_p0 = scmp.ge.s32.totalorder %s27_s17, 2  ;;  %p98_p1 = scmp.ne.s32.totalorder %s1134_s11, %s1130_s10 }
   0x7   : > { %p99_p2 = scmp.eq.s32.totalorder %s875_s15, 1  ;;  %p104_p3 = scmp.ne.s32.totalorder %s1130_s10, %s1126_s9 }
   0x8   : > { %s1396_s17 = smov (%p29_p0, %s27_s17), 0  ;;  %p105_p5 = scmp.eq.s32.totalorder %s876_s16, 1 }
   0x9   : > { %p1207_p4 = por %p99_p2, %p98_p1  ;;  %s83_s20 = ssub.s32 %s1142_s13, %s1396_s17 }
   0xa   : > { %p880_p6 = scmp.ge.s32.totalorder %s1146_s14, 1  ;;  %p86_p7 = scmp.eq.s32.totalorder %s83_s20, 0 }
   0xb   : > { %p1214_p8 = por %p105_p5, %p104_p3  ;;  %p140_p9 = scmp.lt.s32.totalorder %s1146_s14, 3 }
   0xc   : > { %s1220_s22 = scalar_select %p86_p7, %s1134_s11, %s88_s18  }
   0xd   : > { %p141_p10 = pnand %p880_p6, %p140_p9 }
   0xe   : > { %p167_p11 = scmp.lt.s32.totalorder (!%p141_p10), %s1138_s12, 1  ;;  %v1148_v0 = vmov (!%p141_p10), 0   ;;  %v1052_v3 = vld [vmem:[%s1386_s1] sm:$0xff] (!%p141_p10)   ;;  %vm304_vm0 = vcmask (!%p141_p10), 130048   ;;  %v1054_v5 = vld [vmem:[%s1386_s1 + $0x8] sm:$0xff] (!%p141_p10)   ;;  %v1056_v7 = vld [vmem:[%s1386_s1 + $0x10] sm:$0xff] (!%p141_p10)  }
   0xf   : > { %144 = sbr.rel (%p141_p10) target bundleno = 319 (0x13f), region = 28  ;;  %385 = vmatprep.mubr.bf16.mxu0 (!%p141_p10), %v1148_v0  ;;  %465 = vmatprep.mubr.bf16.mxu1 (!%p141_p10), %v1148_v0  ;;  %v1053_v4 = vld [vmem:[%s1386_s1 + $0x40] sm:$0xff] (!%p141_p10)   ;;  %v1055_v6 = vld [vmem:[%s1386_s1 + $0x48] sm:$0xff] (!%p141_p10)   ;;  %v1057_v8 = vld [vmem:[%s1386_s1 + $0x50] sm:$0xff] (!%p141_p10)   ;;  %s1149_s5 = smov (!%p141_p10), [#allocation2]  }
  0x10   : > { %v1058_v9 = vld [vmem:[%s1386_s1 + $0x18] sm:$0xff] (!%p141_p10)   ;;  %v1060_v11 = vld [vmem:[%s1386_s1 + $0x20] sm:$0xff] (!%p141_p10)   ;;  %v1062_v13 = vld [vmem:[%s1386_s1 + $0x28] sm:$0xff] (!%p141_p10)   ;;  %s1072_s6 = sshll.u32 (!%p141_p10), %s1149_s5, 4  ;;  %s1073_s6 = int_to_ptr.vmem [resolvable:$false] %s1072_s6 }
  0x11   : > { %v1059_v10 = vld [vmem:[%s1386_s1 + $0x58] sm:$0xff] (!%p141_p10)   ;;  %v1061_v12 = vld [vmem:[%s1386_s1 + $0x60] sm:$0xff] (!%p141_p10)   ;;  %v1063_v14 = vld [vmem:[%s1386_s1 + $0x68] sm:$0xff] (!%p141_p10)   ;;  %s1074_s7 = scalar_lea.vmem (!%p141_p10), %s1073_s6, 8192 }
  0x12   : > { %v1064_v15 = vld [vmem:[%s1386_s1 + $0x30] sm:$0xff] (!%p141_p10)   ;;  %v1066_v17 = vld [vmem:[%s1386_s1 + $0x38] sm:$0xff] (!%p141_p10)  }
  0x13   : > { %v1065_v16 = vld [vmem:[%s1386_s1 + $0x70] sm:$0xff] (!%p141_p10)   ;;  %v1067_v18 = vld [vmem:[%s1386_s1 + $0x78] sm:$0xff] (!%p141_p10)  }
  0x16   : > { %s168_s23 = scalar_select %p167_p11, %s1138_s12, 1 }
  0x18   : > { %s955_s24 = sshll.u32 %s168_s23, 4 }
  0x19   : > { %s171_s27 = scalar_lea.vmem %s1385_s0, %s955_s24  ;;  %s164_s24 = sand.u32 1, %s1130_s10  }
  0x1a   : > { %v1049_v1 = vld [vmem:[%s171_s27 + $0x4] ss:$8 sps:$4 sm:$0xff]   ;;  %v1051_v2 = vld [vmem:[%s171_s27] ss:$8 sps:$4 sm:$0xff]   ;;  %s881_s25 = sshll.u32 %s164_s24, 8  ;;  %s988_s27 = sshll.u32 %s1138_s12, 12 }
  0x1b   : > { %353 = vmatprep.subr.bf16.mxu0 %v1049_v1  ;;  %989 = vmatprep.subr.bf16.mxu1 %v1049_v1  ;;  %s1294_s26 = scalar_lea.vmem [#allocation2], %s881_s25  ;;  %s1329_s3 = scalar_lea.hbm %s1387_s2, %s988_s27 }
  0x1c   : > { %354 = vmatpush1.bf16.msra.mxu0 %v1051_v2  ;;  %990 = vmatpush1.bf16.msra.mxu1 %v1051_v2  ;;  %s787_s28 = sshll.u32 %s1294_s26, 4  ;;  %s1339_s12 = scalar_lea.sflag [#allocation3], %s164_s24  ;;  %s1331_s28 = int_to_ptr.vmem [resolvable:$true] %s787_s28 }
  0x1d   : > { %s1068_s4 = scalar_lea.vmem %s1331_s28, 4096  ;;  %p1075_p1 = scmp.lt.s32.totalorder %s1331_s28, %s1073_s6 }
  0x1e   : > { %p1069_p12 = scmp.ne.s32.totalorder %s1331_s28, %s1068_s4  ;;  %p1076_p2 = scmp.lt.s32.totalorder %s1074_s7, %s1068_s4 }
  0x1f   : > { %902 = vmatmul.mubr.msk.bf16.vlgmr.msra.gmra.mrb[0].mxu0 %vm304_vm0, %v1052_v3  ;;  %910 = vmatmul.mubr.msk.bf16.vlgmr.msra.gmra.mrb[0].mxu1 %vm304_vm0, %v1053_v4 }
  0x20   : > { %395 = vmatprep.mubr.bf16.mxu0 %v1148_v0  ;;  %475 = vmatprep.mubr.bf16.mxu1 %v1148_v0  ;;  %p1070_p13 = pnand %p1069_p12, %p1207_p4  ;;  %p1077_p3 = por %p1076_p2, %p1075_p1 }
  0x22   : > { %p1071_p0 = pneg %p1070_p13 }
  0x24   : > { %p1078_p5 = pnand %p1077_p3, %p1071_p0 }
  0x27   : > { %903 = vmatmul.mubr.msk.bf16.gmra.mrb[4].mxu0 %vm304_vm0, %v1054_v5  ;;  %911 = vmatmul.mubr.msk.bf16.gmra.mrb[4].mxu1 %vm304_vm0, %v1055_v6 }
  0x28   : > { %405 = vmatprep.mubr.bf16.mxu0 %v1148_v0  ;;  %485 = vmatprep.mubr.bf16.mxu1 %v1148_v0 }
  0x2f   : > { %904 = vmatmul.mubr.msk.bf16.gmra.mrb[8].mxu0 %vm304_vm0, %v1056_v7  ;;  %912 = vmatmul.mubr.msk.bf16.gmra.mrb[8].mxu1 %vm304_vm0, %v1057_v8 }
  0x30   : > { %415 = vmatprep.mubr.bf16.mxu0 %v1148_v0  ;;  %495 = vmatprep.mubr.bf16.mxu1 %v1148_v0 }
  0x37   : > { %905 = vmatmul.mubr.msk.bf16.gmra.mrb[12].mxu0 %vm304_vm0, %v1058_v9  ;;  %913 = vmatmul.mubr.msk.bf16.gmra.mrb[12].mxu1 %vm304_vm0, %v1059_v10 }
  0x38   : > { %425 = vmatprep.mubr.bf16.mxu0 %v1148_v0  ;;  %505 = vmatprep.mubr.bf16.mxu1 %v1148_v0 }
  0x3f   : > { %906 = vmatmul.mubr.msk.bf16.gmra.mrb[16].mxu0 %vm304_vm0, %v1060_v11  ;;  %914 = vmatmul.mubr.msk.bf16.gmra.mrb[16].mxu1 %vm304_vm0, %v1061_v12 }
  0x40   : > { %435 = vmatprep.mubr.bf16.mxu0 %v1148_v0  ;;  %515 = vmatprep.mubr.bf16.mxu1 %v1148_v0 }
  0x47   : > { %907 = vmatmul.mubr.msk.bf16.gmra.mrb[20].mxu0 %vm304_vm0, %v1062_v13  ;;  %915 = vmatmul.mubr.msk.bf16.gmra.mrb[20].mxu1 %vm304_vm0, %v1063_v14 }
  0x48   : > { %445 = vmatprep.mubr.bf16.mxu0 %v1148_v0  ;;  %525 = vmatprep.mubr.bf16.mxu1 %v1148_v0 }
  0x4f   : > { %908 = vmatmul.mubr.msk.bf16.gmra.mrb[24].mxu0 %vm304_vm0, %v1064_v15  ;;  %916 = vmatmul.mubr.msk.bf16.gmra.mrb[24].mxu1 %vm304_vm0, %v1065_v16 }
  0x50   : > { %455 = vmatprep.mubr.bf16.mxu0 %v1148_v0  ;;  %535 = vmatprep.mubr.bf16.mxu1 %v1148_v0 }
  0x57   : > { %909 = vmatmul.mubr.msk.bf16.gmra.mrb[28].mxu0 %vm304_vm0, %v1066_v17  ;;  %917 = vmatmul.mubr.msk.bf16.gmra.mrb[28].mxu1 %vm304_vm0, %v1067_v18 }
  0xf2   : > { %v387_v19 = vpop.f32.mrb[0].mxu0  ;;  %v467_v20 = vpop.f32.mrb[0].mxu1 }
  0xf3   : > { %v389_v21 = vpop.f32.mrb[1].mxu0  ;;  %v469_v22 = vpop.f32.mrb[1].mxu1 }
  0xf4   : > { %v956_v23 = vpack.c.bf16 %v389_v21, %v387_v19  ;;  %v972_v24 = vpack.c.bf16 %v469_v22, %v467_v20  ;;  %v391_v25 = vpop.f32.mrb[2].mxu0  ;;  %v471_v26 = vpop.f32.mrb[2].mxu1 }
  0xf5   : > { %v393_v27 = vpop.f32.mrb[3].mxu0  ;;  %v473_v28 = vpop.f32.mrb[3].mxu1 }
  0xf6   : > { %738 = vst [vmem:[%s1294_s26] sm:$0xff] %v956_v23  ;;  %754 = vst [vmem:[%s1294_s26 + $0x80] sm:$0xff] %v972_v24  ;;  %v957_v29 = vpack.c.bf16 %v393_v27, %v391_v25  ;;  %v973_v30 = vpack.c.bf16 %v473_v28, %v471_v26 }
  0xf8   : > { %739 = vst [vmem:[%s1294_s26 + $0x8] sm:$0xff] %v957_v29  ;;  %755 = vst [vmem:[%s1294_s26 + $0x88] sm:$0xff] %v973_v30 }
  0xfa   : > { %v397_v31 = vpop.f32.mrb[4].mxu0  ;;  %v477_v32 = vpop.f32.mrb[4].mxu1 }
  0xfb   : > { %v399_v33 = vpop.f32.mrb[5].mxu0  ;;  %v479_v34 = vpop.f32.mrb[5].mxu1 }
  0xfc   : > { %v958_v35 = vpack.c.bf16 %v399_v33, %v397_v31  ;;  %v974_v36 = vpack.c.bf16 %v479_v34, %v477_v32  ;;  %v401_v37 = vpop.f32.mrb[6].mxu0  ;;  %v481_v38 = vpop.f32.mrb[6].mxu1 }
  0xfd   : > { %v403_v39 = vpop.f32.mrb[7].mxu0  ;;  %v483_v40 = vpop.f32.mrb[7].mxu1 }
  0xfe   : > { %740 = vst [vmem:[%s1294_s26 + $0x10] sm:$0xff] %v958_v35  ;;  %756 = vst [vmem:[%s1294_s26 + $0x90] sm:$0xff] %v974_v36  ;;  %v959_v41 = vpack.c.bf16 %v403_v39, %v401_v37  ;;  %v975_v42 = vpack.c.bf16 %v483_v40, %v481_v38 }
 0x100   : > { %741 = vst [vmem:[%s1294_s26 + $0x18] sm:$0xff] %v959_v41  ;;  %757 = vst [vmem:[%s1294_s26 + $0x98] sm:$0xff] %v975_v42 }
 0x102   : > { %v407_v43 = vpop.f32.mrb[8].mxu0  ;;  %v487_v44 = vpop.f32.mrb[8].mxu1 }
 0x103   : > { %v409_v45 = vpop.f32.mrb[9].mxu0  ;;  %v489_v46 = vpop.f32.mrb[9].mxu1 }
 0x104   : > { %v960_v47 = vpack.c.bf16 %v409_v45, %v407_v43  ;;  %v976_v48 = vpack.c.bf16 %v489_v46, %v487_v44  ;;  %v411_v49 = vpop.f32.mrb[10].mxu0  ;;  %v491_v50 = vpop.f32.mrb[10].mxu1 }
 0x105   : > { %v413_v51 = vpop.f32.mrb[11].mxu0  ;;  %v493_v52 = vpop.f32.mrb[11].mxu1 }
 0x106   : > { %742 = vst [vmem:[%s1294_s26 + $0x20] sm:$0xff] %v960_v47  ;;  %758 = vst [vmem:[%s1294_s26 + $0xa0] sm:$0xff] %v976_v48  ;;  %v961_v53 = vpack.c.bf16 %v413_v51, %v411_v49  ;;  %v977_v54 = vpack.c.bf16 %v493_v52, %v491_v50 }
 0x108   : > { %743 = vst [vmem:[%s1294_s26 + $0x28] sm:$0xff] %v961_v53  ;;  %759 = vst [vmem:[%s1294_s26 + $0xa8] sm:$0xff] %v977_v54 }
 0x10a   : > { %v417_v55 = vpop.f32.mrb[12].mxu0  ;;  %v497_v56 = vpop.f32.mrb[12].mxu1 }
 0x10b   : > { %v419_v57 = vpop.f32.mrb[13].mxu0  ;;  %v499_v58 = vpop.f32.mrb[13].mxu1 }
 0x10c   : > { %v962_v59 = vpack.c.bf16 %v419_v57, %v417_v55  ;;  %v978_v60 = vpack.c.bf16 %v499_v58, %v497_v56  ;;  %v421_v61 = vpop.f32.mrb[14].mxu0  ;;  %v501_v62 = vpop.f32.mrb[14].mxu1 }
 0x10d   : > { %v423_v63 = vpop.f32.mrb[15].mxu0  ;;  %v503_v0 = vpop.f32.mrb[15].mxu1 }
 0x10e   : > { %744 = vst [vmem:[%s1294_s26 + $0x30] sm:$0xff] %v962_v59  ;;  %760 = vst [vmem:[%s1294_s26 + $0xb0] sm:$0xff] %v978_v60  ;;  %v963_v1 = vpack.c.bf16 %v423_v63, %v421_v61  ;;  %v979_v2 = vpack.c.bf16 %v503_v0, %v501_v62 }
 0x110   : > { %745 = vst [vmem:[%s1294_s26 + $0x38] sm:$0xff] %v963_v1  ;;  %761 = vst [vmem:[%s1294_s26 + $0xb8] sm:$0xff] %v979_v2 }
 0x112   : > { %v427_v3 = vpop.f32.mrb[16].mxu0  ;;  %v507_v4 = vpop.f32.mrb[16].mxu1 }
 0x113   : > { %v429_v5 = vpop.f32.mrb[17].mxu0  ;;  %v509_v6 = vpop.f32.mrb[17].mxu1 }
 0x114   : > { %v964_v7 = vpack.c.bf16 %v429_v5, %v427_v3  ;;  %v980_v8 = vpack.c.bf16 %v509_v6, %v507_v4  ;;  %v431_v9 = vpop.f32.mrb[18].mxu0  ;;  %v511_v10 = vpop.f32.mrb[18].mxu1 }
 0x115   : > { %v433_v11 = vpop.f32.mrb[19].mxu0  ;;  %v513_v12 = vpop.f32.mrb[19].mxu1 }
 0x116   : > { %746 = vst [vmem:[%s1294_s26 + $0x40] sm:$0xff] %v964_v7  ;;  %762 = vst [vmem:[%s1294_s26 + $0xc0] sm:$0xff] %v980_v8  ;;  %v965_v13 = vpack.c.bf16 %v433_v11, %v431_v9  ;;  %v981_v14 = vpack.c.bf16 %v513_v12, %v511_v10 }
 0x118   : > { %747 = vst [vmem:[%s1294_s26 + $0x48] sm:$0xff] %v965_v13  ;;  %763 = vst [vmem:[%s1294_s26 + $0xc8] sm:$0xff] %v981_v14 }
 0x11a   : > { %v437_v15 = vpop.f32.mrb[20].mxu0  ;;  %v517_v16 = vpop.f32.mrb[20].mxu1 }
 0x11b   : > { %v439_v17 = vpop.f32.mrb[21].mxu0  ;;  %v519_v18 = vpop.f32.mrb[21].mxu1 }
 0x11c   : > { %v966_v19 = vpack.c.bf16 %v439_v17, %v437_v15  ;;  %v982_v20 = vpack.c.bf16 %v519_v18, %v517_v16  ;;  %v441_v21 = vpop.f32.mrb[22].mxu0  ;;  %v521_v22 = vpop.f32.mrb[22].mxu1 }
 0x11d   : > { %v443_v23 = vpop.f32.mrb[23].mxu0  ;;  %v523_v24 = vpop.f32.mrb[23].mxu1 }
 0x11e   : > { %748 = vst [vmem:[%s1294_s26 + $0x50] sm:$0xff] %v966_v19  ;;  %764 = vst [vmem:[%s1294_s26 + $0xd0] sm:$0xff] %v982_v20  ;;  %v967_v25 = vpack.c.bf16 %v443_v23, %v441_v21  ;;  %v983_v26 = vpack.c.bf16 %v523_v24, %v521_v22 }
 0x120   : > { %749 = vst [vmem:[%s1294_s26 + $0x58] sm:$0xff] %v967_v25  ;;  %765 = vst [vmem:[%s1294_s26 + $0xd8] sm:$0xff] %v983_v26 }
 0x122   : > { %v447_v27 = vpop.f32.mrb[24].mxu0  ;;  %v527_v28 = vpop.f32.mrb[24].mxu1 }
 0x123   : > { %v449_v29 = vpop.f32.mrb[25].mxu0  ;;  %v529_v30 = vpop.f32.mrb[25].mxu1 }
 0x124   : > { %v968_v31 = vpack.c.bf16 %v449_v29, %v447_v27  ;;  %v984_v32 = vpack.c.bf16 %v529_v30, %v527_v28  ;;  %v451_v33 = vpop.f32.mrb[26].mxu0  ;;  %v531_v34 = vpop.f32.mrb[26].mxu1 }
 0x125   : > { %v453_v35 = vpop.f32.mrb[27].mxu0  ;;  %v533_v36 = vpop.f32.mrb[27].mxu1 }
 0x126   : > { %750 = vst [vmem:[%s1294_s26 + $0x60] sm:$0xff] %v968_v31  ;;  %766 = vst [vmem:[%s1294_s26 + $0xe0] sm:$0xff] %v984_v32  ;;  %v969_v37 = vpack.c.bf16 %v453_v35, %v451_v33  ;;  %v985_v38 = vpack.c.bf16 %v533_v36, %v531_v34 }
 0x128   : > { %751 = vst [vmem:[%s1294_s26 + $0x68] sm:$0xff] %v969_v37  ;;  %767 = vst [vmem:[%s1294_s26 + $0xe8] sm:$0xff] %v985_v38 }
 0x12a   : > { %v457_v39 = vpop.f32.mrb[28].mxu0  ;;  %v537_v40 = vpop.f32.mrb[28].mxu1 }
 0x12b   : > { %v459_v41 = vpop.f32.mrb[29].mxu0  ;;  %v539_v42 = vpop.f32.mrb[29].mxu1 }
 0x12c   : > { %v970_v43 = vpack.c.bf16 %v459_v41, %v457_v39  ;;  %v986_v44 = vpack.c.bf16 %v539_v42, %v537_v40  ;;  %v461_v45 = vpop.f32.mrb[30].mxu0  ;;  %v541_v46 = vpop.f32.mrb[30].mxu1 }
 0x12d   : > { %v463_v47 = vpop.f32.mrb[31].mxu0  ;;  %v543_v48 = vpop.f32.mrb[31].mxu1 }
 0x12e   : > { %752 = vst [vmem:[%s1294_s26 + $0x70] sm:$0xff] %v970_v43  ;;  %768 = vst [vmem:[%s1294_s26 + $0xf0] sm:$0xff] %v986_v44  ;;  %v971_v49 = vpack.c.bf16 %v463_v47, %v461_v45  ;;  %v987_v50 = vpack.c.bf16 %v543_v48, %v541_v46 }
 0x130   : > { %753 = vst [vmem:[%s1294_s26 + $0x78] sm:$0xff] %v971_v49  ;;  %769 = vst [vmem:[%s1294_s26 + $0xf8] sm:$0xff] %v987_v50 }
 0x131   : > { %1081 = shalt.err (!%p1078_p5)
}
 0x132   : > { %s1082_s8 = scalar_lea.hbm %s1329_s3, 4096  ;;  %s1086_s18 = scalar_lea.hbm %s1387_s2, 8192 }
 0x133   : > { %p1083_p6 = scmp.ne.s32.totalorder %s1329_s3, %s1082_s8  ;;  %p1087_p10 = scmp.lt.u32.totalorder %s1329_s3, %s1387_s2 }
 0x134   : > { %p1088_p11 = scmp.lt.u32.totalorder %s1086_s18, %s1082_s8  ;;  %p1090_p13 = scmp.lt.u32.totalorder %s1082_s8, %s1329_s3 }
 0x135   : > { %p1084_p7 = pnand %p1083_p6, %p1207_p4 }
 0x136   : > { %p1089_p12 = por %p1088_p11, %p1087_p10 }
 0x137   : > { %p1085_p9 = pneg %p1084_p7 }
 0x138   : > { %p1091_p0 = por %p1090_p13, %p1089_p12 }
 0x13a   : > { %p1092_p1 = pnand %p1091_p0, %p1085_p9 }
 0x13c   : > { %1095 = shalt.err (!%p1092_p1)
}
 0x13d   : > { %s1150_s24 = smov 128   ;;  %s1151_s25 = smov 8  }
 0x13e   : > { %991 = dma.vmem_to_hbm [thread:$0]  (%p1207_p4), %s1331_s28, 4096, %s1329_s3, %s1339_s12, %s1150_s24, %s1150_s24, %s1151_s25  }
 0x13f PF: > { %p997_p2 = scmp.ge.s32.totalorder %s1146_s14, 2  ;;  %s802_s26 = sand.u32 1, %s1126_s9  }
 0x140   : > { %s803_s27 = scalar_lea.sflag [#allocation3], %s802_s26 }
 0x141   : > { %p994_p3 = pnand %p997_p2, %p1214_p8 }
 0x143   : > { %1121 = dma.done.wait (!%p994_p3), %s803_s27, 4096  }
 0x144   : > { %1123 = vsyncadd (!%p994_p3), %s803_s27, 4294963200  ;;  %s15_s14 = sadd.s32 1, %s1146_s14   ;;  %s1390_s9 = smov %s1130_s10 }
 0x145   : > { %p12_p5 = scmp.ge.s32.totalorder %s15_s14, 4   ;;  %s1391_s10 = smov %s1134_s11 }
 0x146   : > { %s1392_s11 = smov %s1220_s22  ;;  %s1393_s12 = smov %s1142_s13 }
 0x147   : > { %s1394_s13 = smov %s1396_s17  ;;  %14 = sbr.rel (!%p12_p5) target bundleno = 4 (0x4), region = 66 }
 0x14e   :  { %808 = vsyncpa [#allocation3], 1 }
 0x14f   :  { %810 = vsyncpa [#allocation3 + $0x1], 1 }

</bundles_post_ra>
